<compile_context>
chip_gen: v7x
topology: tpu7x:2x2x1
jax: 0.10.0
libtpu: 0.0.40
codegen_flags: <defaults>
</compile_context>

<pallas_src>
import functools

import jax
import jax.numpy as jnp
from jax.experimental import pallas as pl
from jax.experimental.pallas import tpu as pltpu


def _round_up(n, m):
    return ((n + m - 1) // m) * m


def _temp_scale_kernel(x_ref, wf_ref, wl_ref, b_ref, invt_ref, o_ref, *scratch, n_k):
    """Fused: feat = x0 @ Wf (K-tiled) ; logits = feat @ Wl_T + b ; out = logits * (1/T).

    x_ref    : (TB, TK)  VMEM bf16   CLS-token slab, K tile
    wf_ref   : (TK, Hp)  VMEM bf16   backbone projection, K slab (resident when n_k == 1)
    wl_ref   : (Hp, Cp)  VMEM bf16   classifier weight, pre-transposed (K, N) orientation
    b_ref    : (1,  Cp)  VMEM f32    classifier bias
    invt_ref : (1,  1)   SMEM f32    1 / temperature
    o_ref    : (TB, Cp)  VMEM f32    temperature-scaled logits
    scratch  : [(TB, Hp) VMEM f32]   feature accumulator, only allocated when n_k > 1
    """
    # Backbone projection (stands in for model.forward_features on token 0).
    # bf16 x bf16 -> f32 accumulate on the MXU.
    part = jnp.dot(x_ref[...], wf_ref[...], preferred_element_type=jnp.float32)

    if n_k == 1:
        # Single K step: no accumulator round-trip at all.
        feat = part.astype(jnp.bfloat16)
        logits = jnp.dot(feat, wl_ref[...], preferred_element_type=jnp.float32)
        o_ref[...] = (logits + b_ref[...]) * invt_ref[0, 0]
    else:
        acc_ref = scratch[0]
        k = pl.program_id(1)

        @pl.when(k == 0)
        def _first():
            acc_ref[...] = part                 # store, not zero-init + accumulate

        @pl.when(k != 0)
        def _accumulate():
            acc_ref[...] += part

        @pl.when(k == n_k - 1)
        def _finalize():
            feat = acc_ref[...].astype(jnp.bfloat16)
            # model.linear: feat @ W^T, W already transposed to (Hp, Cp) at prep time.
            logits = jnp.dot(feat, wl_ref[...], preferred_element_type=jnp.float32)
            # Temperature scaling as a scalar reciprocal-multiply; epilogue stays in f32.
            o_ref[...] = (logits + b_ref[...]) * invt_ref[0, 0]


def prepare_temperature_scaling_params(w_feat, w_lin, b_lin):
    """One-time weight preparation (pad to (8,128) grain, bf16 cast, classifier transpose).

    w_feat: (H, H) synthetic backbone projection.
    w_lin : (C, H) PyTorch nn.Linear weight layout.
    b_lin : (C,)   nn.Linear bias.
    """
    H = w_feat.shape[0]
    C = w_lin.shape[0]
    Hp = _round_up(H, 128)
    Cp = _round_up(C, 128)
    wf = jnp.pad(w_feat.astype(jnp.bfloat16), ((0, Hp - H), (0, Hp - H)))          # (Hp, Hp)
    wl_t = jnp.pad(w_lin.astype(jnp.bfloat16).T, ((0, Hp - H), (0, Cp - C)))       # (Hp, Cp)
    b = jnp.pad(b_lin.astype(jnp.float32), (0, Cp - C)).reshape(1, Cp)             # (1, Cp)
    return {"wf": wf, "wl_t": wl_t, "b": b, "H": H, "C": C}


def model_with_temperature_forward(x, params, temperature, *, tb=256):
    """x: (B, S, H).  params: output of prepare_temperature_scaling_params.
    temperature: scalar or (1,) array.  Returns temperature-scaled logits (B, C) float32."""
    B, S, H = x.shape
    assert H == params["H"], "hidden size mismatch with prepared params"
    wf, wl_t, b = params["wf"], params["wl_t"], params["b"]
    C = params["C"]
    Hp, Cp = wl_t.shape

    # ---- batch tiling -------------------------------------------------------------------
    TB = max(8, min(_round_up(B, 8), tb))          # sublane-aligned batch tile (big for AI)
    Bp = _round_up(B, TB)
    # v7x megacore: make sure the "parallel" batch axis has >= 2 tiles when batch permits.
    while Bp // TB < 2 and TB > 128:
        TB = max(8, _round_up(TB // 2, 8))
        Bp = _round_up(B, TB)
    n_bt = Bp // TB

    # ---- K tiling under a per-generation VMEM budget -------------------------------------
    try:
        vmem_cap = int(getattr(pltpu.get_tpu_info(), "vmem_capacity_bytes", 64 << 20))
    except Exception:  # pragma: no cover - conservative fallback (v7x per-TC size)
        vmem_cap = 64 << 20
    budget = int(0.70 * vmem_cap)

    def _vmem_need(tk):
        # Conservative: inputs/outputs double-buffered by the BlockSpec pipeline.
        return (2 * TB * tk * 2          # x0 tile (bf16)
                + 2 * tk * Hp * 2        # w_feat slab (bf16)
                + 2 * Hp * Cp * 2        # classifier, resident (bf16)
                + 2 * Cp * 4             # bias
                + 2 * TB * Cp * 4        # output tile (f32)
                + (TB * Hp * 4 if Hp // tk > 1 else 0))   # f32 accumulator scratch

    TK = 128                                           # always divides Hp (Hp % 128 == 0)
    for cand in [Hp] + [t for t in (1024, 512, 256, 128) if t < Hp and Hp % t == 0]:
        if _vmem_need(cand) <= budget:
            TK = cand
            break
    n_k = Hp // TK
    vmem_limit = int(min(0.90 * vmem_cap, max(32 << 20, _vmem_need(TK) + (8 << 20))))

    # ---- per-call input prep (CLS token slab only; weights were prepared once) -----------
    x0 = jnp.pad(x[:, 0, :].astype(jnp.bfloat16), ((0, Bp - B), (0, Hp - H)))
    inv_t = (1.0 / jnp.asarray(temperature, jnp.float32).reshape(-1)[0]).reshape(1, 1)

    scratch_shapes = [pltpu.VMEM((TB, Hp), jnp.float32)] if n_k > 1 else []
    kernel = functools.partial(_temp_scale_kernel, n_k=n_k)

    # HBM traffic: w_feat is re-streamed per batch tile only when K-tiled; when TK == Hp its
    # block index is constant so it is DMA'd exactly once.
    bytes_accessed = (Bp * Hp * 2
                      + Hp * Hp * 2 * (n_bt if n_k > 1 else 1)
                      + Hp * Cp * 2 + Cp * 4 + Bp * Cp * 4)

    # TODO(synk): pipeline_mode=pl.Buffered(1) on the constant-index wl/bias/wf specs would
    #             halve their VMEM footprint; kept at the default for lowering robustness.
    out_padded = pl.pallas_call(
        kernel,
        out_shape=jax.ShapeDtypeStruct((Bp, Cp), jnp.float32),
        grid_spec=pltpu.PrefetchScalarGridSpec(
            num_scalar_prefetch=0,
            grid=(n_bt, n_k),
            in_specs=[
                pl.BlockSpec((TB, TK), lambda i, k: (i, k)),          # x0 tile
                pl.BlockSpec((TK, Hp), lambda i, k: (k, 0)),          # w_feat K slab
                pl.BlockSpec((Hp, Cp), lambda i, k: (0, 0)),          # classifier (resident)
                pl.BlockSpec((1, Cp), lambda i, k: (0, 0)),           # bias
                pl.BlockSpec(memory_space=pltpu.MemorySpace.SMEM),    # 1/T scalar
            ],
            out_specs=pl.BlockSpec((TB, Cp), lambda i, k: (i, 0)),
            scratch_shapes=scratch_shapes,
        ),
        compiler_params=pltpu.CompilerParams(
            dimension_semantics=("parallel", "arbitrary"),
            vmem_limit_bytes=vmem_limit,
        ),
        cost_estimate=pl.CostEstimate(
            flops=2 * Bp * Hp * Hp + 2 * Bp * Hp * Cp,
            transcendentals=0,
            bytes_accessed=bytes_accessed,
        ),
    )(x0, wf, wl_t, b, inv_t)

    return out_padded[:B, :C]


if __name__ == "__main__":
    key = jax.random.PRNGKey(0)
    B, S, H, C = 2, 8, 32, 16

    k_x, k_wf, k_wl, k_b = jax.random.split(key, 4)
    x = jax.random.normal(k_x, (B, S, H), dtype=jnp.float32)
    w_feat = jax.random.normal(k_wf, (H, H), dtype=jnp.float32) * 0.1   # synthetic backbone
    w_lin = jax.random.normal(k_wl, (C, H), dtype=jnp.float32) * 0.1    # nn.Linear weight (C, H)
    b_lin = jax.random.normal(k_b, (C,), dtype=jnp.float32) * 0.1       # nn.Linear bias
    # nn.Parameter init is 1.0; use a post-calibration-style value to exercise the scaling.
    temperature = jnp.ones((1,), dtype=jnp.float32) * 1.7

    params = prepare_temperature_scaling_params(w_feat, w_lin, b_lin)   # one-time prep
    out = model_with_temperature_forward(x, params, temperature)
    jax.block_until_ready(out)

    # Pure-JAX reference with the same bf16-operand / f32-accumulate arithmetic.
    x0b = x[:, 0, :].astype(jnp.bfloat16)
    feat = jnp.dot(x0b, w_feat.astype(jnp.bfloat16), preferred_element_type=jnp.float32)
    logits = jnp.dot(feat.astype(jnp.bfloat16), w_lin.astype(jnp.bfloat16).T,
                     preferred_element_type=jnp.float32)
    ref = (logits + b_lin) / temperature[0]

    assert out.shape == (B, C)
    assert jnp.allclose(out, ref, atol=2e-3, rtol=2e-3)

    # Loose check against the exact f32 math too (bf16 operands introduce ~0.5% error).
    ref_f32 = ((x[:, 0, :] @ w_feat) @ w_lin.T + b_lin) / temperature[0]
    assert jnp.allclose(out, ref_f32, atol=5e-2, rtol=5e-2)

    print("KERNEL_OK")
</pallas_src>

<mosaic_0001>
module attributes {stable_mosaic.version = 11 : i64} {
  func.func @_temp_scale_kernel(%arg0: i32, %arg1: i32, %arg2: memref<8x128xbf16, #tpu.memory_space<vmem>>, %arg3: memref<128x128xbf16, #tpu.memory_space<vmem>>, %arg4: memref<128x128xbf16, #tpu.memory_space<vmem>>, %arg5: memref<1x128xf32, #tpu.memory_space<vmem>>, %arg6: memref<1x1xf32, #tpu.memory_space<smem>>, %arg7: memref<8x128xf32, #tpu.memory_space<vmem>>) attributes {dimension_semantics = [#tpu.dimension_semantics<parallel>, #tpu.dimension_semantics<arbitrary>], iteration_bounds = array<i64: 1, 1>, scalar_prefetch = 0 : i64, scratch_operands = 0 : i64, tpu.core_type = #tpu.core_type<tc>, window_params = [{transform_indices = @transform_0, window_bounds = array<i64: 8, 128>}, {transform_indices = @transform_1, window_bounds = array<i64: 128, 128>}, {pipeline_mode = #tpu.pipeline_mode<synchronous>, transform_indices = @transform_2, window_bounds = array<i64: 128, 128>}, {pipeline_mode = #tpu.pipeline_mode<synchronous>, transform_indices = @transform_3, window_bounds = array<i64: 1, 128>}, {transform_indices = @transform_4, window_bounds = array<i64: 1, 1>}, {transform_indices = @transform_5, window_bounds = array<i64: 8, 128>}]} {
    %c0 = arith.constant 0 : index
    %c0_0 = arith.constant 0 : index
    %0 = vector.load %arg2[%c0, %c0_0] : memref<8x128xbf16, #tpu.memory_space<vmem>>, vector<8x128xbf16>
    %c0_1 = arith.constant 0 : index
    %c0_2 = arith.constant 0 : index
    %1 = vector.load %arg3[%c0_1, %c0_2] : memref<128x128xbf16, #tpu.memory_space<vmem>>, vector<128x128xbf16>
    %cst = arith.constant dense<0.000000e+00> : vector<8x128xf32>
    %2 = tpu.matmul %0, %1, %cst {dimension_numbers = #tpu.dot_dimension_numbers<[1], [0], [0], [1], [0, 0, 1, 1], [], []>} : vector<8x128xbf16>, vector<128x128xbf16>, vector<8x128xf32> -> vector<8x128xf32>
    %3 = arith.truncf %2 : vector<8x128xf32> to vector<8x128xbf16>
    %c0_3 = arith.constant 0 : index
    %c0_4 = arith.constant 0 : index
    %4 = vector.load %arg4[%c0_3, %c0_4] : memref<128x128xbf16, #tpu.memory_space<vmem>>, vector<128x128xbf16>
    %cst_5 = arith.constant dense<0.000000e+00> : vector<8x128xf32>
    %5 = tpu.matmul %3, %4, %cst_5 {dimension_numbers = #tpu.dot_dimension_numbers<[1], [0], [0], [1], [0, 0, 1, 1], [], []>} : vector<8x128xbf16>, vector<128x128xbf16>, vector<8x128xf32> -> vector<8x128xf32>
    %c0_6 = arith.constant 0 : index
    %c0_7 = arith.constant 0 : index
    %6 = vector.load %arg5[%c0_6, %c0_7] : memref<1x128xf32, #tpu.memory_space<vmem>>, vector<1x128xf32>
    %7 = vector.broadcast %6 : vector<1x128xf32> to vector<8x128xf32>
    %8 = arith.addf %5, %7 : vector<8x128xf32>
    %c0_8 = arith.constant 0 : index
    %c0_9 = arith.constant 0 : index
    %9 = memref.load %arg6[%c0_8, %c0_9] : memref<1x1xf32, #tpu.memory_space<smem>>
    %10 = vector.broadcast %9 : f32 to vector<8x128xf32>
    %11 = arith.mulf %8, %10 : vector<8x128xf32>
    %c0_10 = arith.constant 0 : index
    %c0_11 = arith.constant 0 : index
    %12 = vector.load %arg7[%c0_10, %c0_11] : memref<8x128xf32, #tpu.memory_space<vmem>>, vector<8x128xf32>
    tpu.vector_store %arg7[%c0_10, %c0_11], %11 {strides = array<i32>} : memref<8x128xf32, #tpu.memory_space<vmem>>, vector<8x128xf32>,
    return
  }
  func.func @transform_0(%arg0: i32, %arg1: i32) -> (i32, i32) {
    %c0_i32 = arith.constant 0 : i32
    return %arg0, %arg1 : i32, i32
  }
  func.func @transform_1(%arg0: i32, %arg1: i32) -> (i32, i32) {
    %c0_i32 = arith.constant 0 : i32
    %c0_i32_0 = arith.constant 0 : i32
    return %arg1, %c0_i32 : i32, i32
  }
  func.func @transform_2(%arg0: i32, %arg1: i32) -> (i32, i32) {
    %c0_i32 = arith.constant 0 : i32
    %c0_i32_0 = arith.constant 0 : i32
    %c0_i32_1 = arith.constant 0 : i32
    return %c0_i32, %c0_i32_0 : i32, i32
  }
  func.func @transform_3(%arg0: i32, %arg1: i32) -> (i32, i32) {
    %c0_i32 = arith.constant 0 : i32
    %c0_i32_0 = arith.constant 0 : i32
    %c0_i32_1 = arith.constant 0 : i32
    return %c0_i32, %c0_i32_0 : i32, i32
  }
  func.func @transform_4(%arg0: i32, %arg1: i32) -> (i32, i32) {
    %c0_i32 = arith.constant 0 : i32
    %c0_i32_0 = arith.constant 0 : i32
    %c0_i32_1 = arith.constant 0 : i32
    return %c0_i32, %c0_i32_0 : i32, i32
  }
  func.func @transform_5(%arg0: i32, %arg1: i32) -> (i32, i32) {
    %c0_i32 = arith.constant 0 : i32
    %c0_i32_0 = arith.constant 0 : i32
    return %arg0, %c0_i32 : i32, i32
  }
}

</mosaic_0001>

<bundles_post_ra>
// kernel: tpu_custom_call.1
= control target key start
LH: loop header
LB: loop body
LE: loop exit
PB: predicated region body
PF: predicated region fallthrough
CT: control target
= control target key end

     0   :  { %11 = vsyncpa [#allocation4], 0  ;;  %s590_s0 = inlined_call_operand.hbm [shape: bf16[8,128], index: 0, kind: input, shape index: {}]   ;;  %s591_s1 = inlined_call_operand.hbm [shape: bf16[128,128], index: 1, kind: input, shape index: {}]   ;;  %s592_s2 = inlined_call_operand.hbm [shape: bf16[128,128], index: 2, kind: input, shape index: {}]   ;;  %s593_s3 = inlined_call_operand.vmem [shape: f32[1,128], index: 3, kind: input, shape index: {}]   ;;  %s594_s4 = inlined_call_operand.<no memory space> [shape: f32[1,1], index: 4, kind: input, shape index: {}]   ;;  %s595_s5 = inlined_call_operand.hbm [shape: f32[8,128], index: 5, kind: output, shape index: {}]  }
   0x1   :  { %12 = vsyncpa [#allocation7], 0 }
   0x2   :  { %13 = vsyncpa [#allocation5], 0  ;;  %s492_s18 = smov [#allocation6]   ;;  %s398_s22 = scalar_lea.hbm %s591_s1, 1024 }
   0x3   :  { %s29_s19 = sshll.u32 %s492_s18, 4  ;;  %p399_p0 = scmp.ne.s32.totalorder %s591_s1, %s398_s22  ;;  %s30_s19 = int_to_ptr.vmem [resolvable:$true] %s29_s19 }
   0x4   :  { %p402_p1 = scmp.lt.u32.totalorder %s398_s22, %s591_s1 }
   0x6   :  { %p404_p2 = pnand %p402_p1, %p399_p0 }
   0x8   :  { %407 = shalt.err (!%p404_p2)
}
   0x9   :  { %s408_s27 = scalar_lea.vmem %s30_s19, 1024  ;;  %p413_p4 = scmp.lt.s32.totalorder %s30_s19, %s30_s19 }
   0xa   :  { %p409_p3 = scmp.ne.s32.totalorder %s30_s19, %s408_s27  ;;  %p414_p5 = scmp.lt.s32.totalorder %s408_s27, %s408_s27 }
   0xc   :  { %p415_p6 = por %p414_p5, %p413_p4 }
   0xe   :  { %p416_p7 = pnand %p415_p6, %p409_p3 }
  0x10   :  { %419 = shalt.err (!%p416_p7)
}
  0x11   :  { %s493_s28 = smov 64   ;;  %s494_s29 = smov 4  }
  0x12   :  { %35 = dma.hbm_to_vmem [thread:$0]  %s591_s1, 1024, %s30_s19, [#allocation7], %s493_s28, %s493_s28, %s494_s29  }
  0x13   :  { %s495_s7 = smov [#allocation3]   ;;  %s496_s9 = smov [#allocation8]  }
  0x14   :  { %s20_s8 = sshll.u32 %s495_s7, 4  ;;  %s41_s10 = sshll.u32 %s496_s9, 4  ;;  %s21_s8 = int_to_ptr.vmem [resolvable:$true] %s20_s8  ;;  %s42_s10 = int_to_ptr.vmem [resolvable:$true] %s41_s10 }
  0x15   :  { %s420_s13 = scalar_lea.hbm %s590_s0, 64 }
  0x16   :  { %p421_p8 = scmp.ne.s32.totalorder %s590_s0, %s420_s13  ;;  %p424_p9 = scmp.lt.u32.totalorder %s420_s13, %s590_s0 }
  0x18   :  { %p426_p10 = pnand %p424_p9, %p421_p8 }
  0x1a   :  { %429 = shalt.err (!%p426_p10)
}
  0x1b   :  { %s430_s1 = scalar_lea.vmem %s21_s8, 64  ;;  %p435_p12 = scmp.lt.s32.totalorder %s21_s8, %s21_s8 }
  0x1c   :  { %p431_p11 = scmp.ne.s32.totalorder %s21_s8, %s430_s1  ;;  %p436_p13 = scmp.lt.s32.totalorder %s430_s1, %s430_s1 }
  0x1e   :  { %p437_p0 = por %p436_p13, %p435_p12 }
  0x20   :  { %p438_p1 = pnand %p437_p0, %p431_p11 }
  0x22   :  { %441 = shalt.err (!%p438_p1)
}
  0x23   :  { %23 = dma.hbm_to_vmem [thread:$0]  %s590_s0, 64, %s21_s8, [#allocation4]  }
  0x24   :  { %s442_s22 = scalar_lea.hbm %s592_s2, 1024 }
  0x25   :  { %p443_p2 = scmp.ne.s32.totalorder %s592_s2, %s442_s22  ;;  %p446_p3 = scmp.lt.u32.totalorder %s442_s22, %s592_s2 }
  0x27   :  { %p448_p4 = pnand %p446_p3, %p443_p2 }
  0x29   :  { %451 = shalt.err (!%p448_p4)
}
  0x2a   :  { %s452_s27 = scalar_lea.vmem %s42_s10, 1024  ;;  %p457_p6 = scmp.lt.s32.totalorder %s42_s10, %s42_s10 }
  0x2b   :  { %p453_p5 = scmp.ne.s32.totalorder %s42_s10, %s452_s27  ;;  %p458_p7 = scmp.lt.s32.totalorder %s452_s27, %s452_s27 }
  0x2d   :  { %p459_p8 = por %p458_p7, %p457_p6 }
  0x2f   :  { %p460_p9 = pnand %p459_p8, %p453_p5 }
  0x31   :  { %463 = shalt.err (!%p460_p9)
}
  0x32   :  { %47 = dma.hbm_to_vmem [thread:$0]  %s592_s2, 1024, %s42_s10, [#allocation7], %s493_s28, %s493_s28, %s494_s29  }
  0x33   :  { %486 = dma.done.wait [#allocation4], 64  }
  0x34   :  { %487 = vsyncadd [#allocation4], 4294967232 }
  0x35   :  { %488 = dma.done.wait [#allocation7], 2048  }
  0x36   :  { %489 = vsyncadd [#allocation7], 4294965248  ;;  %v497_v0 = vmov 0.0   ;;  %vm498_vm0 = vmmov 0   ;;  %v382_v1 = vld [vmem:[#allocation6] sm:$0xff]   ;;  %v383_v2 = vld [vmem:[#allocation6 + $0x8] sm:$0xff]   ;;  %v280_v25 = vstv %s594_s4 }
  0x37   :  { %334 = vmatprep.subr.bf16.mxu0 %v497_v0  ;;  %350 = vmatprep.mubr.msk.bf16.mxu0 %vm498_vm0, %v497_v0  ;;  %v384_v3 = vld [vmem:[#allocation6 + $0x10] sm:$0xff]   ;;  %v390_v4 = vld [vmem:[#allocation8] sm:$0xff]   ;;  %v385_v5 = vld [vmem:[#allocation6 + $0x18] sm:$0xff]   ;;  %s499_s7 = smov [#allocation9]  }
  0x38   :  { %354 = vmatprep.subr.bf16.mxu1 %v497_v0  ;;  %370 = vmatprep.mubr.msk.bf16.mxu1 %vm498_vm0, %v497_v0  ;;  %v391_v6 = vld [vmem:[#allocation8 + $0x8] sm:$0xff]   ;;  %v386_v7 = vld [vmem:[#allocation6 + $0x20] sm:$0xff]   ;;  %v392_v8 = vld [vmem:[#allocation8 + $0x10] sm:$0xff]   ;;  %s289_s8 = sshll.u32 %s499_s7, 4  ;;  %s290_s8 = int_to_ptr.vmem [resolvable:$true] %s289_s8 }
  0x39   :  { %335 = vmatpush3.bf16.msra.mxu0 %v382_v1  ;;  %355 = vmatpush3.bf16.msra.mxu1 %v390_v4  ;;  %v387_v9 = vld [vmem:[#allocation6 + $0x28] sm:$0xff]   ;;  %v393_v10 = vld [vmem:[#allocation8 + $0x18] sm:$0xff]   ;;  %v388_v11 = vld [vmem:[#allocation6 + $0x30] sm:$0xff]   ;;  %s464_s9 = scalar_lea.vmem %s290_s8, 128  ;;  %p469_p11 = scmp.lt.s32.totalorder %s290_s8, %s290_s8 }
  0x3a   :  { %336 = vmatprep.subr.bf16.mxu0 %v497_v0  ;;  %356 = vmatprep.subr.bf16.mxu1 %v497_v0  ;;  %v394_v12 = vld [vmem:[#allocation8 + $0x20] sm:$0xff]   ;;  %v389_v13 = vld [vmem:[#allocation6 + $0x38] sm:$0xff]   ;;  %v395_v14 = vld [vmem:[#allocation8 + $0x28] sm:$0xff]   ;;  %p465_p10 = scmp.ne.s32.totalorder %s290_s8, %s464_s9  ;;  %p470_p12 = scmp.lt.s32.totalorder %s464_s9, %s464_s9 }
  0x3b   :  { %v62_v15 = vld [vmem:[#allocation3] sm:$0xf]  ;;  %v396_v16 = vld [vmem:[#allocation8 + $0x30] sm:$0xff]  }
  0x3c   :  { %v397_v17 = vld [vmem:[#allocation8 + $0x38] sm:$0xff]   ;;  %p471_p13 = por %p470_p12, %p469_p11 }
  0x3d   :  { %337 = vmatpush3.bf16.msra.mxu0 %v383_v2  ;;  %357 = vmatpush3.bf16.msra.mxu1 %v391_v6  ;;  %v307_v23 = vld [vmem:[%s593_s3] ss:$0 sm:$0xff] }
  0x3e   :  { %338 = vmatprep.subr.bf16.mxu0 %v497_v0  ;;  %358 = vmatprep.subr.bf16.mxu1 %v497_v0  ;;  %p472_p0 = pnand %p471_p13, %p465_p10 }
  0x41   :  { %339 = vmatpush3.bf16.msra.mxu0 %v384_v3  ;;  %359 = vmatpush3.bf16.msra.mxu1 %v392_v8 }
  0x42   :  { %340 = vmatprep.subr.bf16.mxu0 %v497_v0  ;;  %360 = vmatprep.subr.bf16.mxu1 %v497_v0 }
  0x45   :  { %341 = vmatpush3.bf16.msra.mxu0 %v385_v5  ;;  %361 = vmatpush3.bf16.msra.mxu1 %v393_v10 }
  0x46   :  { %342 = vmatprep.subr.bf16.mxu0 %v497_v0  ;;  %362 = vmatprep.subr.bf16.mxu1 %v497_v0 }
  0x49   :  { %343 = vmatpush3.bf16.msra.mxu0 %v386_v7  ;;  %363 = vmatpush3.bf16.msra.mxu1 %v394_v12 }
  0x4a   :  { %344 = vmatprep.subr.bf16.mxu0 %v497_v0  ;;  %364 = vmatprep.subr.bf16.mxu1 %v497_v0 }
  0x4d   :  { %345 = vmatpush3.bf16.msra.mxu0 %v387_v9  ;;  %365 = vmatpush3.bf16.msra.mxu1 %v395_v14 }
  0x4e   :  { %346 = vmatprep.subr.bf16.mxu0 %v497_v0  ;;  %366 = vmatprep.subr.bf16.mxu1 %v497_v0 }
  0x51   :  { %347 = vmatpush3.bf16.msra.mxu0 %v388_v11  ;;  %367 = vmatpush3.bf16.msra.mxu1 %v396_v16 }
  0x52   :  { %348 = vmatprep.subr.bf16.mxu0 %v497_v0  ;;  %368 = vmatprep.subr.bf16.mxu1 %v497_v0 }
  0x55   :  { %349 = vmatpush3.bf16.msra.mxu0 %v389_v13  ;;  %369 = vmatpush3.bf16.msra.mxu1 %v397_v17 }
  0x58   :  { %351 = vmatmul.mubr.bf16.vlgmr.msra.gmra.mrb[0].mxu0 %v62_v15 }
 0x12b   :  { %v161_v18 = vpop.f32.mrb[0].mxu0 }
 0x12c   :  { %v167_v19 = vpack.c.bf16 %v161_v18, %v161_v18  ;;  %v352_v20 = vpop.f32.mrb[1].mxu0 }
 0x12d   :  { %v164_v21 = vpop.f32.mrb[2].mxu0 }
 0x12e   :  { %v353_v22 = vpop.f32.mrb[3].mxu0  ;;  %371 = vmatmul.mubr.bf16.vlgmr.msra.gmra.mrb[0].mxu1 %v167_v19 }
 0x201   :  { %v273_v24 = vpop.f32.mrb[0].mxu1 }
 0x202   :  { %v274_v26 = vadd.f32 %v307_v23, %v273_v24  ;;  %v372_v27 = vpop.f32.mrb[1].mxu1 }
 0x203   :  { %v276_v28 = vpop.f32.mrb[2].mxu1 }
 0x204   :  { %v281_v29 = vmul.f32 %v280_v25, %v274_v26  ;;  %v373_v30 = vpop.f32.mrb[3].mxu1 }
 0x206   :  { %282 = vst [vmem:[#allocation9] sm:$0xff] %v281_v29 }
 0x207   :  { %475 = shalt.err (!%p472_p0)
}
 0x208   :  { %s476_s4 = scalar_lea.hbm %s595_s5, 128 }
 0x209   :  { %p477_p1 = scmp.ne.s32.totalorder %s595_s5, %s476_s4  ;;  %p480_p2 = scmp.lt.u32.totalorder %s476_s4, %s595_s5 }
 0x20b   :  { %p482_p3 = pnand %p480_p2, %p477_p1 }
 0x20d   :  { %485 = shalt.err (!%p482_p3)
}
 0x20e   :  { %292 = dma.vmem_to_hbm [thread:$0]  %s290_s8, 128, %s595_s5, [#allocation5]  }
 0x20f   :  { %490 = dma.done.wait [#allocation5], 128  }
 0x210   :  { %491 = vsyncadd [#allocation5], 4294967168 }
 0x211   :  { %296 = vsyncpa [#allocation4], 1 }
 0x212   :  { %297 = vsyncpa [#allocation7], 1 }
 0x213   :  { %298 = vsyncpa [#allocation5], 1 }

</bundles_post_ra>
